<compile_context>
chip_gen: v7x
topology: tpu7x:2x2x1
jax: 0.10.0
libtpu: 0.0.40
codegen_flags: <defaults>
</compile_context>

<pallas_src>
import functools

import jax
import jax.numpy as jnp
from jax import lax
from jax.experimental import pallas as pl
from jax.experimental.pallas import tpu as pltpu

LN_EPS = 1e-5
_NEG_BIG = -1e30
_F32_TEMP_BYTES = 16        # in-kernel f32 full-tile temporaries, per element
_ROUND = 128                # lane granularity


def _cdiv(a, b):
    return -(-a // b)


def _round_up(a, m):
    return _cdiv(a, m) * m


def _vmem_capacity_bytes():
    try:
        info = pltpu.get_tpu_info()
        for name in ("vmem_capacity_bytes", "vmem_size_bytes", "vmem_bytes"):
            val = getattr(info, name, None)
            if val:
                return int(val)
    except Exception:
        pass
    return 64 << 20             # conservative fallback: v7x per-TensorCore VMEM


def _vmem_budgets():
    cap = _vmem_capacity_bytes()
    return int(cap * 0.4), int(cap * 0.7)   # (tile-picking budget, vmem_limit_bytes)


def _pick_batch_tile(batch, per_elem_bytes, budget_bytes):
    """Largest divisor of `batch` whose footprint fits the budget, capped so
    there are >= 4 grid steps when batch allows (>=2 for batch in [2,3])."""
    max_bt = max(1, budget_bytes // max(1, per_elem_bytes))
    if batch >= 4:
        max_bt = min(max_bt, batch // 4)
    elif batch >= 2:
        max_bt = min(max_bt, batch // 2)
    max_bt = max(1, max_bt)
    bt = 1
    for d in range(1, batch + 1):
        if batch % d == 0 and d <= max_bt:
            bt = d
    return bt


def _channel_add_mlp(ctx, w1t_ref, b1_ref, ln_g_ref, ln_b_ref, w2t_ref, b2_ref):
    """(Bt, C) context -> (Bt, C) channel-add term: 1x1 conv -> LN -> ReLU -> 1x1 conv."""
    h = jnp.dot(ctx, w1t_ref[...], preferred_element_type=jnp.float32) + b1_ref[...]
    mu = jnp.mean(h, axis=-1, keepdims=True)
    var = jnp.mean(jnp.square(h - mu), axis=-1, keepdims=True)   # biased, like nn.LayerNorm
    hn = (h - mu) * lax.rsqrt(var + LN_EPS)
    hn = hn * ln_g_ref[...] + ln_b_ref[...]
    hn = jnp.maximum(hn, 0.0)
    return jnp.dot(hn, w2t_ref[...], preferred_element_type=jnp.float32) + b2_ref[...]


# ---------------------------------------------------------------------------
# Path A: fused single-pass kernel — one (Bt, C, S) batch tile per grid step.
# ---------------------------------------------------------------------------
def _context_block_fused_kernel(x_ref, wm_ref, w1t_ref, b1_ref, ln_g_ref,
                                ln_b_ref, w2t_ref, b2_ref, out_ref):
    x = x_ref[...].astype(jnp.float32)                  # (Bt, C, S) f32 math
    logits = x * wm_ref[...]                            # depthwise 1x1 (bm dropped)
    m = jnp.max(logits, axis=-1, keepdims=True)         # (Bt, C, 1)
    e = jnp.exp(logits - m)
    num = jnp.sum(x * e, axis=-1)                       # (Bt, C)
    den = jnp.sum(e, axis=-1)                           # (Bt, C)
    ctx = num / den
    add = _channel_add_mlp(ctx, w1t_ref, b1_ref, ln_g_ref, ln_b_ref,
                           w2t_ref, b2_ref)             # (Bt, C)
    # Re-read x in its I/O dtype so the f32 copy above is dead after the
    # reduction (halves the final-pass VMEM load bytes for bf16 I/O).
    out_ref[...] = (x_ref[...].astype(jnp.float32)
                    + add[:, :, None]).astype(out_ref.dtype)


# ---------------------------------------------------------------------------
# Path B: S-tiled two-pass — pass 1: online-softmax reduction + channel MLP
#                            pass 2: out = x + add (broadcast over spatial)
# ---------------------------------------------------------------------------
def _context_reduce_kernel(x_ref, wm_ref, w1t_ref, b1_ref, ln_g_ref, ln_b_ref,
                           w2t_ref, b2_ref, add_ref, m_sc, num_sc, den_sc,
                           *, s_total, s_tile):
    s_idx = pl.program_id(1)

    @pl.when(s_idx == 0)
    def _():
        m_sc[...] = jnp.full_like(m_sc, -jnp.inf)
        num_sc[...] = jnp.zeros_like(num_sc)
        den_sc[...] = jnp.zeros_like(den_sc)

    x = x_ref[...].astype(jnp.float32)                  # (Bt, C, St)
    logits = x * wm_ref[...]
    if s_total % s_tile != 0:                           # only the trailing block is partial
        col = lax.broadcasted_iota(jnp.int32, logits.shape, 2)
        valid = col < (s_total - s_idx * s_tile)
        logits = jnp.where(valid, logits, _NEG_BIG)     # NaN-safe masking of pad lanes
        x = jnp.where(valid, x, 0.0)

    m_old = m_sc[...]                                   # (Bt, C)
    m_new = jnp.maximum(m_old, jnp.max(logits, axis=-1))
    scale = jnp.exp(m_old - m_new)
    e = jnp.exp(logits - m_new[:, :, None])
    den_sc[...] = den_sc[...] * scale + jnp.sum(e, axis=-1)
    num_sc[...] = num_sc[...] * scale + jnp.sum(x * e, axis=-1)
    m_sc[...] = m_new

    @pl.when(s_idx == pl.num_programs(1) - 1)
    def _():
        ctx = num_sc[...] / den_sc[...]
        add = _channel_add_mlp(ctx, w1t_ref, b1_ref, ln_g_ref, ln_b_ref,
                               w2t_ref, b2_ref)          # (Bt, C)
        add_ref[...] = add[:, :, None]                   # (Bt, C, 1)


def _context_add_kernel(x_ref, add_ref, out_ref):
    out_ref[...] = (x_ref[...].astype(jnp.float32)
                    + add_ref[...]).astype(out_ref.dtype)


def _make_weight_specs(C, P, idx):
    return [
        pl.BlockSpec((C, 1), idx),    # wm
        pl.BlockSpec((C, P), idx),    # w1^T
        pl.BlockSpec((1, P), idx),    # b1
        pl.BlockSpec((1, P), idx),    # ln gamma
        pl.BlockSpec((1, P), idx),    # ln beta
        pl.BlockSpec((P, C), idx),    # w2^T
        pl.BlockSpec((1, C), idx),    # b2
    ]


@functools.partial(jax.jit, static_argnames=("force_s_tile",))
def context_block_forward(x, params, force_s_tile=None):
    """x: (B, C, H, W), f32 or bf16, NCHW. Returns (B, C, H, W), same dtype."""
    B, C, H, W = x.shape
    S = H * W
    P = params["w1"].shape[0]
    itemsize = jnp.dtype(x.dtype).itemsize

    xr = x.reshape(B, C, S)                              # no lane padding

    f32 = jnp.float32
    wm = params["wm"].reshape(C, 1).astype(f32)          # bm intentionally unused (shift-invariant)
    w1t = params["w1"].T.reshape(C, P).astype(f32)
    b1 = params["b1"].reshape(1, P).astype(f32)
    ln_g = params["ln_g"].reshape(1, P).astype(f32)
    ln_b = params["ln_b"].reshape(1, P).astype(f32)
    w2t = params["w2"].T.reshape(P, C).astype(f32)
    b2 = params["b2"].reshape(1, C).astype(f32)
    weights = (wm, w1t, b1, ln_g, ln_b, w2t, b2)

    budget, vmem_limit = _vmem_budgets()
    per_elem_fused = C * S * (4 * itemsize + _F32_TEMP_BYTES)   # 2 in + 2 out bufs + f32 temps
    # TODO(synk): if S < 128 and a single (1, C, S) tile still exceeds the
    # budget (needs C > ~6000), an intra-block channel split would be needed.
    use_fused = (force_s_tile is None) and (per_elem_fused <= budget or S < _ROUND)

    if use_fused:
        Bt = _pick_batch_tile(B, per_elem_fused, budget)
        xmap = lambda b: (b, 0, 0)
        out = pl.pallas_call(
            _context_block_fused_kernel,
            out_shape=jax.ShapeDtypeStruct((B, C, S), x.dtype),
            grid=(B // Bt,),
            in_specs=[pl.BlockSpec((Bt, C, S), xmap)]
                     + _make_weight_specs(C, P, lambda b: (0, 0)),
            out_specs=pl.BlockSpec((Bt, C, S), xmap),
            input_output_aliases={0: 0},                 # out = x + add, in place
            compiler_params=pltpu.CompilerParams(
                dimension_semantics=("parallel",),
                vmem_limit_bytes=vmem_limit),
        )(xr, *weights)
        return out.reshape(B, C, H, W)

    # ---- S-tiled two-pass path (large C*S, e.g. C=1024, S=56*56 on v7x) ----
    if force_s_tile is not None:
        St = int(force_s_tile)
    else:
        st_max = (budget // (C * (4 * itemsize + _F32_TEMP_BYTES))) // _ROUND * _ROUND
        st_max = max(_ROUND, st_max)
        St = min(st_max, _round_up(_cdiv(S, _cdiv(S, st_max)), _ROUND))
    ns = _cdiv(S, St)
    Bt = 1                                               # per-element footprint is huge here;
    nb = B // Bt                                         # s-tiling supplies the grid steps

    wmap2 = lambda b, s: (0, 0)
    xmap2 = lambda b, s: (b, 0, s)
    amap2 = lambda b, s: (b, 0, 0)

    reduce_kernel = functools.partial(_context_reduce_kernel, s_total=S, s_tile=St)
    add_term = pl.pallas_call(
        reduce_kernel,
        out_shape=jax.ShapeDtypeStruct((B, C, 1), jnp.float32),
        grid=(nb, ns),
        in_specs=[pl.BlockSpec((Bt, C, St), xmap2)] + _make_weight_specs(C, P, wmap2),
        out_specs=pl.BlockSpec((Bt, C, 1), amap2),
        scratch_shapes=[pltpu.VMEM((Bt, C), jnp.float32)] * 3,   # m, num, den
        compiler_params=pltpu.CompilerParams(
            dimension_semantics=("parallel", "arbitrary"),
            vmem_limit_bytes=vmem_limit),
    )(xr, *weights)

    out = pl.pallas_call(
        _context_add_kernel,
        out_shape=jax.ShapeDtypeStruct((B, C, S), x.dtype),
        grid=(nb, ns),
        in_specs=[pl.BlockSpec((Bt, C, St), xmap2),
                  pl.BlockSpec((Bt, C, 1), amap2)],
        out_specs=pl.BlockSpec((Bt, C, St), xmap2),
        input_output_aliases={0: 0},
        compiler_params=pltpu.CompilerParams(
            dimension_semantics=("parallel", "parallel"),
            vmem_limit_bytes=vmem_limit),
    )(xr, add_term)
    return out.reshape(B, C, H, W)


# ---------------------------------------------------------------------------
# Pure-JAX reference mirroring the PyTorch forward ('att' + 'channel_add').
# ---------------------------------------------------------------------------
def context_block_reference(x, params):
    B, C, H, W = x.shape
    S = H * W
    xr = x.reshape(B, C, S).astype(jnp.float32)
    logits = xr * params["wm"].reshape(1, C, 1) + params["bm"].reshape(1, C, 1)
    p = jax.nn.softmax(logits, axis=2)
    ctx = jnp.einsum("bcs,bcs->bc", xr, p)                      # (B, C)
    h = ctx @ params["w1"].T + params["b1"]                     # (B, P)
    mu = h.mean(-1, keepdims=True)
    var = ((h - mu) ** 2).mean(-1, keepdims=True)               # biased, like nn.LayerNorm
    h = (h - mu) / jnp.sqrt(var + LN_EPS) * params["ln_g"] + params["ln_b"]
    h = jnp.maximum(h, 0.0)
    add = h @ params["w2"].T + params["b2"]                     # (B, C)
    return xr.reshape(B, C, H, W) + add[:, :, None, None]


def make_params(key, inplanes, ratio):
    # reset_parameters() zeroes the last conv (identity block), so use random
    # values to actually exercise the kernel.
    planes = int(inplanes * ratio)
    assert planes >= 1
    ks = jax.random.split(key, 8)
    wm = jax.random.normal(ks[0], (inplanes,), jnp.float32) * 0.5     # conv_mask weight (depthwise)
    bm = jax.random.normal(ks[1], (inplanes,), jnp.float32) * 0.1     # conv_mask bias
    w1 = jax.random.normal(ks[2], (planes, inplanes), jnp.float32) * 0.3
    b1 = jax.random.normal(ks[3], (planes,), jnp.float32) * 0.1
    ln_g = 1.0 + 0.1 * jax.random.normal(ks[4], (planes,), jnp.float32)
    ln_b = 0.1 * jax.random.normal(ks[5], (planes,), jnp.float32)
    w2 = jax.random.normal(ks[6], (inplanes, planes), jnp.float32) * 0.3
    b2 = jax.random.normal(ks[7], (inplanes,), jnp.float32) * 0.1
    return dict(wm=wm, bm=bm, w1=w1, b1=b1, ln_g=ln_g, ln_b=ln_b, w2=w2, b2=b2)


if __name__ == "__main__":
    key = jax.random.PRNGKey(0)
    kx, kp, kx2, kx3 = jax.random.split(key, 4)

    B, C = 2, 8
    ratio = 0.25   # planes = 2
    params = make_params(kp, C, ratio)

    def check(out, ref, rtol, atol, name):
        o = out.astype(jnp.float32)
        err = float(jnp.max(jnp.abs(o - ref)))
        assert bool(jnp.allclose(o, ref, rtol=rtol, atol=atol)), (name, err)

    # 1) Fused path, lane-aligned S (16*16 = 256), f32 I/O.
    x = jax.random.normal(kx, (B, C, 16, 16), jnp.float32)
    out = jax.block_until_ready(context_block_forward(x, params))
    assert out.shape == x.shape and out.dtype == x.dtype
    check(out, context_block_reference(x, params), 1e-3, 1e-3, "fused S=256 f32")

    # 2) Fused path, non-128-multiple S (7*7 = 49): no padding, masked store tail only.
    x2 = jax.random.normal(kx2, (B, C, 7, 7), jnp.float32)
    out2 = jax.block_until_ready(context_block_forward(x2, params))
    check(out2, context_block_reference(x2, params), 1e-3, 1e-3, "fused S=49 f32")

    # 3) Fused path, bf16 I/O (f32 math inside the kernel).
    xb = x.astype(jnp.bfloat16)
    outb = jax.block_until_ready(context_block_forward(xb, params))
    assert outb.dtype == jnp.bfloat16
    check(outb, context_block_reference(xb.astype(jnp.float32), params),
          5e-2, 5e-2, "fused bf16")

    # 4) S-tiled two-pass path (forced small S tile), S divisible by the tile.
    out4 = jax.block_until_ready(context_block_forward(x, params, force_s_tile=128))
    check(out4, context_block_reference(x, params), 1e-3, 1e-3, "two-pass S=256 St=128")

    # 5) S-tiled two-pass path with a trailing partial S block (14*14 = 196).
    x3 = jax.random.normal(kx3, (B, C, 14, 14), jnp.float32)
    out5 = jax.block_until_ready(context_block_forward(x3, params, force_s_tile=128))
    check(out5, context_block_reference(x3, params), 1e-3, 1e-3, "two-pass S=196 St=128")

    print("KERNEL_OK")
</pallas_src>

<mosaic_0001>
module attributes {stable_mosaic.version = 11 : i64} {
  func.func @_context_block_fused_kernel(%arg0: i32, %arg1: memref<1x8x256xf32, #tpu.memory_space<vmem>>, %arg2: memref<8x1xf32, #tpu.memory_space<vmem>>, %arg3: memref<8x2xf32, #tpu.memory_space<vmem>>, %arg4: memref<1x2xf32, #tpu.memory_space<vmem>>, %arg5: memref<1x2xf32, #tpu.memory_space<vmem>>, %arg6: memref<1x2xf32, #tpu.memory_space<vmem>>, %arg7: memref<2x8xf32, #tpu.memory_space<vmem>>, %arg8: memref<1x8xf32, #tpu.memory_space<vmem>>, %arg9: memref<1x8x256xf32, #tpu.memory_space<vmem>>) attributes {dimension_semantics = [#tpu.dimension_semantics<parallel>], iteration_bounds = array<i64: 2>, scalar_prefetch = 0 : i64, scratch_operands = 0 : i64, tpu.core_type = #tpu.core_type<tc>, window_params = [{transform_indices = @transform_0, window_bounds = array<i64: 1, 8, 256>}, {pipeline_mode = #tpu.pipeline_mode<synchronous>, transform_indices = @transform_1, window_bounds = array<i64: 8, 1>}, {pipeline_mode = #tpu.pipeline_mode<synchronous>, transform_indices = @transform_2, window_bounds = array<i64: 8, 2>}, {pipeline_mode = #tpu.pipeline_mode<synchronous>, transform_indices = @transform_3, window_bounds = array<i64: 1, 2>}, {pipeline_mode = #tpu.pipeline_mode<synchronous>, transform_indices = @transform_4, window_bounds = array<i64: 1, 2>}, {pipeline_mode = #tpu.pipeline_mode<synchronous>, transform_indices = @transform_5, window_bounds = array<i64: 1, 2>}, {pipeline_mode = #tpu.pipeline_mode<synchronous>, transform_indices = @transform_6, window_bounds = array<i64: 2, 8>}, {pipeline_mode = #tpu.pipeline_mode<synchronous>, transform_indices = @transform_7, window_bounds = array<i64: 1, 8>}, {transform_indices = @transform_8, window_bounds = array<i64: 1, 8, 256>}]} {
    %c0 = arith.constant 0 : index
    %c0_0 = arith.constant 0 : index
    %c0_1 = arith.constant 0 : index
    %0 = vector.load %arg1[%c0, %c0_0, %c0_1] : memref<1x8x256xf32, #tpu.memory_space<vmem>>, vector<1x8x256xf32>
    %c0_2 = arith.constant 0 : index
    %c0_3 = arith.constant 0 : index
    %1 = vector.load %arg2[%c0_2, %c0_3] : memref<8x1xf32, #tpu.memory_space<vmem>>, vector<8x1xf32>
    %2 = vector.shape_cast %1 : vector<8x1xf32> to vector<1x8x1xf32>
    %3 = vector.broadcast %2 : vector<1x8x1xf32> to vector<1x8x256xf32>
    %4 = arith.mulf %0, %3 : vector<1x8x256xf32>
    %cst = arith.constant dense<0xFF800000> : vector<1x8xf32>
    %5 = vector.multi_reduction <maximumf>, %4, %cst [2] : vector<1x8x256xf32> to vector<1x8xf32>
    %6 = vector.shape_cast %5 : vector<1x8xf32> to vector<1x8x1xf32>
    %7 = vector.broadcast %6 : vector<1x8x1xf32> to vector<1x8x256xf32>
    %8 = arith.subf %4, %7 : vector<1x8x256xf32>
    %9 = math.exp %8 : vector<1x8x256xf32>
    %10 = arith.mulf %0, %9 : vector<1x8x256xf32>
    %cst_4 = arith.constant dense<0.000000e+00> : vector<1x8xf32>
    %11 = vector.multi_reduction <add>, %10, %cst_4 [2] : vector<1x8x256xf32> to vector<1x8xf32>
    %cst_5 = arith.constant dense<0.000000e+00> : vector<1x8xf32>
    %12 = vector.multi_reduction <add>, %9, %cst_5 [2] : vector<1x8x256xf32> to vector<1x8xf32>
    %13 = arith.divf %11, %12 : vector<1x8xf32>
    %c0_6 = arith.constant 0 : index
    %c0_7 = arith.constant 0 : index
    %14 = vector.load %arg3[%c0_6, %c0_7] : memref<8x2xf32, #tpu.memory_space<vmem>>, vector<8x2xf32>
    %cst_8 = arith.constant dense<0.000000e+00> : vector<1x2xf32>
    %15 = tpu.matmul %13, %14, %cst_8 {dimension_numbers = #tpu.dot_dimension_numbers<[1], [0], [0], [1], [0, 0, 1, 1], [], []>} : vector<1x8xf32>, vector<8x2xf32>, vector<1x2xf32> -> vector<1x2xf32>
    %c0_9 = arith.constant 0 : index
    %c0_10 = arith.constant 0 : index
    %16 = vector.load %arg4[%c0_9, %c0_10] : memref<1x2xf32, #tpu.memory_space<vmem>>, vector<1x2xf32>
    %17 = arith.addf %15, %16 : vector<1x2xf32>
    %cst_11 = arith.constant dense<0.000000e+00> : vector<1xf32>
    %18 = vector.multi_reduction <add>, %17, %cst_11 [1] : vector<1x2xf32> to vector<1xf32>
    %19 = vector.shape_cast %18 : vector<1xf32> to vector<1x1xf32>
    %cst_12 = arith.constant 2.000000e+00 : f32
    %20 = vector.broadcast %cst_12 : f32 to vector<1x1xf32>
    %21 = arith.divf %19, %20 : vector<1x1xf32>
    %22 = vector.broadcast %21 : vector<1x1xf32> to vector<1x2xf32>
    %23 = arith.subf %17, %22 : vector<1x2xf32>
    %24 = arith.mulf %23, %23 : vector<1x2xf32>
    %cst_13 = arith.constant dense<0.000000e+00> : vector<1xf32>
    %25 = vector.multi_reduction <add>, %24, %cst_13 [1] : vector<1x2xf32> to vector<1xf32>
    %26 = vector.shape_cast %25 : vector<1xf32> to vector<1x1xf32>
    %cst_14 = arith.constant 2.000000e+00 : f32
    %27 = vector.broadcast %cst_14 : f32 to vector<1x1xf32>
    %28 = arith.divf %26, %27 : vector<1x1xf32>
    %29 = vector.broadcast %21 : vector<1x1xf32> to vector<1x2xf32>
    %30 = arith.subf %17, %29 : vector<1x2xf32>
    %cst_15 = arith.constant 9.99999974E-6 : f32
    %31 = vector.broadcast %cst_15 : f32 to vector<1x1xf32>
    %32 = arith.addf %28, %31 : vector<1x1xf32>
    %33 = math.rsqrt %32 : vector<1x1xf32>
    %34 = vector.broadcast %33 : vector<1x1xf32> to vector<1x2xf32>
    %35 = arith.mulf %30, %34 : vector<1x2xf32>
    %c0_16 = arith.constant 0 : index
    %c0_17 = arith.constant 0 : index
    %36 = vector.load %arg5[%c0_16, %c0_17] : memref<1x2xf32, #tpu.memory_space<vmem>>, vector<1x2xf32>
    %37 = arith.mulf %35, %36 : vector<1x2xf32>
    %c0_18 = arith.constant 0 : index
    %c0_19 = arith.constant 0 : index
    %38 = vector.load %arg6[%c0_18, %c0_19] : memref<1x2xf32, #tpu.memory_space<vmem>>, vector<1x2xf32>
    %39 = arith.addf %37, %38 : vector<1x2xf32>
    %cst_20 = arith.constant 0.000000e+00 : f32
    %40 = vector.broadcast %cst_20 : f32 to vector<1x2xf32>
    %41 = arith.maximumf %39, %40 : vector<1x2xf32>
    %c0_21 = arith.constant 0 : index
    %c0_22 = arith.constant 0 : index
    %42 = vector.load %arg7[%c0_21, %c0_22] : memref<2x8xf32, #tpu.memory_space<vmem>>, vector<2x8xf32>
    %cst_23 = arith.constant dense<0.000000e+00> : vector<1x8xf32>
    %43 = tpu.matmul %41, %42, %cst_23 {dimension_numbers = #tpu.dot_dimension_numbers<[1], [0], [0], [1], [0, 0, 1, 1], [], []>} : vector<1x2xf32>, vector<2x8xf32>, vector<1x8xf32> -> vector<1x8xf32>
    %c0_24 = arith.constant 0 : index
    %c0_25 = arith.constant 0 : index
    %44 = vector.load %arg8[%c0_24, %c0_25] : memref<1x8xf32, #tpu.memory_space<vmem>>, vector<1x8xf32>
    %45 = arith.addf %43, %44 : vector<1x8xf32>
    %c0_26 = arith.constant 0 : index
    %c0_27 = arith.constant 0 : index
    %c0_28 = arith.constant 0 : index
    %46 = vector.load %arg1[%c0_26, %c0_27, %c0_28] : memref<1x8x256xf32, #tpu.memory_space<vmem>>, vector<1x8x256xf32>
    %47 = vector.shape_cast %45 : vector<1x8xf32> to vector<1x8x1xf32>
    %48 = vector.broadcast %47 : vector<1x8x1xf32> to vector<1x8x256xf32>
    %49 = arith.addf %46, %48 : vector<1x8x256xf32>
    %c0_29 = arith.constant 0 : index
    %c0_30 = arith.constant 0 : index
    %c0_31 = arith.constant 0 : index
    %50 = vector.load %arg9[%c0_29, %c0_30, %c0_31] : memref<1x8x256xf32, #tpu.memory_space<vmem>>, vector<1x8x256xf32>
    tpu.vector_store %arg9[%c0_29, %c0_30, %c0_31], %49 {strides = array<i32>} : memref<1x8x256xf32, #tpu.memory_space<vmem>>, vector<1x8x256xf32>,
    return
  }
  func.func @transform_0(%arg0: i32) -> (i32, i32, i32) {
    %c0_i32 = arith.constant 0 : i32
    %c0_i32_0 = arith.constant 0 : i32
    %c0_i32_1 = arith.constant 0 : i32
    return %arg0, %c0_i32, %c0_i32_0 : i32, i32, i32
  }
  func.func @transform_1(%arg0: i32) -> (i32, i32) {
    %c0_i32 = arith.constant 0 : i32
    %c0_i32_0 = arith.constant 0 : i32
    %c0_i32_1 = arith.constant 0 : i32
    return %c0_i32, %c0_i32_0 : i32, i32
  }
  func.func @transform_2(%arg0: i32) -> (i32, i32) {
    %c0_i32 = arith.constant 0 : i32
    %c0_i32_0 = arith.constant 0 : i32
    %c0_i32_1 = arith.constant 0 : i32
    return %c0_i32, %c0_i32_0 : i32, i32
  }
  func.func @transform_3(%arg0: i32) -> (i32, i32) {
    %c0_i32 = arith.constant 0 : i32
    %c0_i32_0 = arith.constant 0 : i32
    %c0_i32_1 = arith.constant 0 : i32
    return %c0_i32, %c0_i32_0 : i32, i32
  }
  func.func @transform_4(%arg0: i32) -> (i32, i32) {
    %c0_i32 = arith.constant 0 : i32
    %c0_i32_0 = arith.constant 0 : i32
    %c0_i32_1 = arith.constant 0 : i32
    return %c0_i32, %c0_i32_0 : i32, i32
  }
  func.func @transform_5(%arg0: i32) -> (i32, i32) {
    %c0_i32 = arith.constant 0 : i32
    %c0_i32_0 = arith.constant 0 : i32
    %c0_i32_1 = arith.constant 0 : i32
    return %c0_i32, %c0_i32_0 : i32, i32
  }
  func.func @transform_6(%arg0: i32) -> (i32, i32) {
    %c0_i32 = arith.constant 0 : i32
    %c0_i32_0 = arith.constant 0 : i32
    %c0_i32_1 = arith.constant 0 : i32
    return %c0_i32, %c0_i32_0 : i32, i32
  }
  func.func @transform_7(%arg0: i32) -> (i32, i32) {
    %c0_i32 = arith.constant 0 : i32
    %c0_i32_0 = arith.constant 0 : i32
    %c0_i32_1 = arith.constant 0 : i32
    return %c0_i32, %c0_i32_0 : i32, i32
  }
  func.func @transform_8(%arg0: i32) -> (i32, i32, i32) {
    %c0_i32 = arith.constant 0 : i32
    %c0_i32_0 = arith.constant 0 : i32
    %c0_i32_1 = arith.constant 0 : i32
    return %arg0, %c0_i32, %c0_i32_0 : i32, i32, i32
  }
}

</mosaic_0001>

<bundles_post_ra>
// kernel: context_block_forward.1
= control target key start
LH: loop header
LB: loop body
LE: loop exit
PB: predicated region body
PF: predicated region fallthrough
CT: control target
= control target key end

     0   :  { %s689_s27 = smov 0   ;;  %s744_s0 = inlined_call_operand.vmem [shape: f32[2,8,256], index: 0, kind: input, shape index: {}, may-alias: {0,8}]   ;;  %s745_s1 = inlined_call_operand.vmem [shape: f32[8,1], index: 1, kind: input, shape index: {}]   ;;  %s746_s2 = inlined_call_operand.vmem [shape: f32[8,2], index: 2, kind: input, shape index: {}]   ;;  %s747_s3 = inlined_call_operand.vmem [shape: f32[1,2], index: 3, kind: input, shape index: {}]   ;;  %s748_s4 = inlined_call_operand.vmem [shape: f32[1,2], index: 4, kind: input, shape index: {}]   ;;  %s749_s5 = inlined_call_operand.vmem [shape: f32[1,2], index: 5, kind: input, shape index: {}]   ;;  %s750_s6 = inlined_call_operand.vmem [shape: f32[2,8], index: 6, kind: input, shape index: {}]   ;;  %s751_s7 = inlined_call_operand.vmem [shape: f32[1,8], index: 7, kind: input, shape index: {}]   ;;  %s752_s8 = inlined_call_operand.vmem [shape: f32[2,8,256], index: 8, kind: output, shape index: {}, may-alias: {0,8}]  }
   0x1 LB: > { %s583_s28 = sadd.s32 4294967295, %s639_s27   ;;  %p587_p0 = scmp.ge.s32.totalorder %s639_s27, 1  ;;  %s639_s27 = sphi %s689_s27, %s18_s27  }
   0x2   : > { %p262_p1 = scmp.lt.s32.totalorder %s639_s27, 3 }
   0x4   : > { %p263_p2 = pnand %p587_p0, %p262_p1 }
   0x5   : > { %v308_v0 = vld [vmem:[%s745_s1] sm:$0xff] (!%p263_p2)  ;;  %v641_v1 = vmov (!%p263_p2), 0   ;;  %p296_p3 = scmp.lt.s32.totalorder (!%p263_p2), %s583_s28, 1  ;;  %v642_v19 = vmov (!%p263_p2), 0.0   ;;  %vm643_vm0 = vmmov (!%p263_p2), 0   ;;  %v338_v22 = vlaneseq (!%p263_p2) }
   0x6   : > { %266 = sbr.rel (%p263_p2) target bundleno = 1319 (0x527), region = 52  ;;  %624 = vset.pattern.permute.xlu0 (!%p263_p2), %v641_v1  ;;  %603 = vmatprep.subr.mxu0 (!%p263_p2), %v642_v19  ;;  %v335_v20 = vld [vmem:[%s746_s2] sm:$0xff] (!%p263_p2)  ;;  %vm344_vm1 = vcmask (!%p263_p2), 64512   ;;  %vm417_vm2 = vcmask (!%p263_p2), 8192   ;;  %vm443_vm3 = vcmask (!%p263_p2), 1041408   ;;  %vm439_vm4 = vcmask (!%p263_p2), 15360  }
   0x7   : > { %311 = vperm.xlu0 (!%p263_p2), %624, %v308_v0   ;;  %608 = vmatprep.subr.mxu1 (!%p263_p2), %v642_v19  ;;  %v339_v23 = vand.u32 (!%p263_p2), 127, %v338_v22  ;;  %v341_v24 = vshrl.u32 (!%p263_p2), %v338_v22, 7  ;;  %v336_v30 = vld [vmem:[%s747_s3] sm:$0x1] (!%p263_p2) }
   0x8   : > { %604 = vmatpush3.msra.mxu0 (!%p263_p2), %v335_v20  ;;  %605 = vmatprep.mubr.msk.f32.mxu0 (!%p263_p2), %vm643_vm0, %v642_v19  ;;  %v437_v40 = vld [vmem:[%s750_s6] sm:$0x3] (!%p263_p2) }
   0x9   : > { %610 = vmatprep.mubr.msk.f32.mxu1 (!%p263_p2), %vm643_vm0, %v642_v19  ;;  %v342_v25 = vsub.s32 (!%p263_p2), %v339_v23, %v341_v24  ;;  %609 = vmatpush3.msk.msra.mxu1 (!%p263_p2), %vm443_vm3, %v437_v40  ;;  %v432_v45 = vld [vmem:[%s748_s4] sm:$0x1] (!%p263_p2)  ;;  %v519_v52 = vsub.s32 (!%p263_p2), 0, %v341_v24 }
   0xa   : > { %v434_v47 = vld [vmem:[%s749_s5] sm:$0x1] (!%p263_p2) }
   0xb   : > { %v438_v51 = vld [vmem:[%s751_s7] sm:$0x1] (!%p263_p2) }
   0xd   : > { %s754_s28 = smov (!%p296_p3, %s583_s28), 1 }
   0xe   : > { %s597_s9 = sshll.u32 %s754_s28, 4 }
   0xf   : > { %s300_s12 = scalar_lea.vmem %s744_s0, %s597_s9  ;;  %s305_s29 = scalar_lea.vmem %s752_s8, %s597_s9 }
  0x10   : > { %v708_v2 = vld [vmem:[%s300_s12] sm:$0xff]  ;;  %v710_v3 = vld [vmem:[%s300_s12 + $0x8] sm:$0xff] }
  0x86   : > { %v312_v4 = vpop.permute.xlu0 %311 }
  0x87   : > { %v314_v5 = vmul.f32 %v312_v4, %v708_v2  ;;  %v315_v6 = vmul.f32 %v312_v4, %v710_v3 }
  0x89   : > { %v316_v7 = vmax.f32 %v314_v5, %v315_v6 }
  0x8b   : > { %317 = vmax.xlane.f32.xlu0 %v316_v7 }
 0x118   : > { %v318_v8 = vpop.xlane.xlu0 %317 }
 0x119   : > { %v319_v9 = vsub.f32 %v314_v5, %v318_v8  ;;  %v320_v10 = vsub.f32 %v315_v6, %v318_v8 }
 0x11b   : > { %v321_v11 = vmul.f32 1.442695, %v319_v9  ;;  %v323_v12 = vmul.f32 1.442695, %v320_v10 }
 0x11d   : > { %625 = vpow2.f32 %v321_v11 }
 0x11e   : > { %627 = vpow2.f32 %v323_v12 }
 0x127   : > { %v626_v13 = vpop.eup %625 }
 0x128   : > { %v628_v14 = vpop.eup %627  ;;  %v325_v16 = vmul.f32 %v626_v13, %v708_v2 }
 0x129   : > { %v330_v15 = vadd.f32 %v628_v14, %v626_v13  ;;  %v326_v17 = vmul.f32 %v628_v14, %v710_v3 }
 0x12b   : > { %331 = vadd.xlane.f32.xlu1 %v330_v15  ;;  %v327_v18 = vadd.f32 %v326_v17, %v325_v16 }
 0x12f   : > { %328 = vadd.xlane.f32.xlu1 %v327_v18 }
 0x1b8   : > { %v332_v21 = vpop.xlane.xlu1 %331 }
 0x1b9   : > { %629 = vrcp.f32 %v332_v21 }
 0x1bc   : > { %v329_v27 = vpop.xlane.xlu1 %328 }
 0x1c3   : > { %v630_v26 = vpop.eup %629 }
 0x1c4   : > { %v334_v28 = vmul.f32 %v630_v26, %v329_v27 }
 0x1c6   : > { %v343_v29 = vrot.slane %v334_v28, %v342_v25 }
 0x1c8   : > { %606 = vmatmul.mubr.msk.f32.vlgmr.msra.gmra.mrb[0].mxu0 %vm344_vm1, %v343_v29 }
 0x29b   : > { %v413_v31 = vpop.f32.mrb[0].mxu0 }
 0x29c   : > { %v414_v32 = vadd.f32 %v413_v31, %v336_v30  ;;  %v607_v33 = vpop.f32.mrb[1].mxu0 }
 0x29e   : > { %v418_v34 = vsel %vm417_vm2, %v414_v32, 0.0 }
 0x29f   : > { %419 = vadd.xlane.f32.xlu1 %v418_v34 }
 0x32c   : > { %v420_v35 = vpop.xlane.xlu1 %419 }
 0x32d   : > { %v422_v36 = vmul.f32 0.5, %v420_v35 }
 0x32f   : > { %v423_v37 = vsub.f32 %v414_v32, %v422_v36 }
 0x331   : > { %v424_v38 = vmul.f32 %v423_v37, %v423_v37 }
 0x333   : > { %v425_v39 = vsel %vm417_vm2, %v424_v38, 0.0 }
 0x334   : > { %426 = vadd.xlane.f32.xlu1 %v425_v39 }
 0x3c1   : > { %v427_v41 = vpop.xlane.xlu1 %426 }
 0x3c2   : > { %v428_v42 = vmul.f32 0.5, %v427_v41 }
 0x3c4   : > { %v429_v43 = vadd.f32 1e-05, %v428_v42 }
 0x3c6   : > { %631 = vrsqrt.f32 %v429_v43 }
 0x3d0   : > { %v632_v44 = vpop.eup %631 }
 0x3d1   : > { %v431_v46 = vmul.f32 %v632_v44, %v423_v37 }
 0x3d3   : > { %v433_v48 = vmul.f32 %v432_v45, %v431_v46 }
 0x3d5   : > { %v435_v49 = vadd.f32 %v434_v47, %v433_v48 }
 0x3d7   : > { %v436_v50 = vmax.f32 %v435_v49, 0.0 }
 0x3d9   : > { %611 = vmatmul.mubr.msk.f32.vlgmr.msra.gmra.mrb[0].mxu1 %vm439_vm4, %v436_v50 }
 0x4ac   : > { %v513_v53 = vpop.f32.mrb[0].mxu1 }
 0x4ad   : > { %v514_v54 = vadd.f32 %v513_v53, %v438_v51  ;;  %v612_v55 = vpop.f32.mrb[1].mxu1 }
 0x4af   : > { %v520_v56 = vrot.slane %v514_v54, %v519_v52 }
 0x4b1   : > { %522 = vbcast.lane.b32.xlu1 %v520_v56, 256 }
 0x523   : > { %v523_v57 = vpop.permute.xlu1 %522 }
 0x524   : > { %v524_v58 = vadd.f32 %v523_v57, %v708_v2  ;;  %v525_v59 = vadd.f32 %v523_v57, %v710_v3 }
 0x526   : > { %526 = vst [vmem:[%s305_s29] sm:$0xff] %v524_v58  ;;  %527 = vst [vmem:[%s305_s29 + $0x8] sm:$0xff] %v525_v59 }
 0x527 PF: > { %s18_s27 = sadd.s32 1, %s639_s27  }
 0x528   : > { %p15_p4 = scmp.ge.s32.totalorder %s18_s27, 4  }
 0x52a   :  { %17 = sbr.rel (!%p15_p4) target bundleno = 1 (0x1), region = 82 }

</bundles_post_ra>
